<compile_context>
chip_gen: v7x
topology: tpu7x:2x2x1
jax: 0.10.0
libtpu: 0.0.40
codegen_flags: <defaults>
</compile_context>

<pallas_src>
import functools

import jax
import jax.numpy as jnp
from jax import lax
from jax.experimental import pallas as pl
from jax.experimental.pallas import tpu as pltpu


def _round_up(a, b):
    return (a + b - 1) // b * b


def _vmem_capacity_bytes():
    try:
        return int(pltpu.get_tpu_info().vmem_capacity_bytes)
    except Exception:
        return 64 * 1024 * 1024  # conservative: v7x per-TensorCore VMEM


def _const_spec(shape, index_map):
    """Grid-invariant operand: request single buffering when supported."""
    if hasattr(pl, "Buffered"):
        try:
            return pl.BlockSpec(shape, index_map, pipeline_mode=pl.Buffered(1))
        except TypeError:
            pass
    return pl.BlockSpec(shape, index_map)


# ----------------------------- kernels ---------------------------------------


def _relu_ln_epilogue(y, g, bt, eps, out_dtype):
    y = jnp.maximum(y, 0.0)                                 # ReLU
    mean = jnp.mean(y, axis=-1, keepdims=True)
    msq = jnp.mean(y * y, axis=-1, keepdims=True)
    var = jnp.maximum(msq - mean * mean, 0.0)               # one-pass, biased (PyTorch)
    y = (y - mean) * lax.rsqrt(var + eps)                   # rsqrt -> EUP slot
    y = y * g + bt
    # TODO(synk): dropout omitted (eval/inference mode); a training-mode path
    # would draw a keep-mask via pltpu.prng_seed / pltpu.prng_random_bits.
    return y.astype(out_dtype)


def mlp_block_kernel_resident(x_ref, w_ref, b_ref, g_ref, bt_ref, o_ref, *, eps):
    # x_ref: (TN, Din) bf16; w_ref: (Din, Dout) bf16, resident; params (1, Dout) f32.
    y = jnp.dot(x_ref[...], w_ref[...], preferred_element_type=jnp.float32)
    o_ref[...] = _relu_ln_epilogue(y + b_ref[...], g_ref[...], bt_ref[...],
                                   eps, o_ref.dtype)


def mlp_block_kernel_ktiled(x_ref, w_ref, b_ref, g_ref, bt_ref, o_ref, acc_ref, *, eps):
    # x_ref: (TN, TK); w_ref: (TK, Dout); acc_ref: (TN, Dout) f32 scratch.
    k = pl.program_id(1)
    partial = jnp.dot(x_ref[...], w_ref[...], preferred_element_type=jnp.float32)

    @pl.when(k == 0)
    def _():
        acc_ref[...] = partial                 # no zero-fill + add on first K step

    @pl.when(k != 0)
    def _():
        acc_ref[...] += partial

    @pl.when(k == pl.num_programs(1) - 1)
    def _():
        o_ref[...] = _relu_ln_epilogue(acc_ref[...] + b_ref[...],
                                       g_ref[...], bt_ref[...], eps, o_ref.dtype)


# ----------------------------- wrapper ----------------------------------------


def mlp_block(x, w, b, gamma, beta, *, eps=1e-5, matmul_dtype=jnp.bfloat16):
    """Fused MLPBlock forward: LayerNorm(ReLU(x @ w.T + b)) * gamma + beta.

    x: [N, Din]; w: [Dout, Din] (PyTorch Linear layout); b/gamma/beta: [Dout].
    """
    N, Din = x.shape
    Dout, Din_w = w.shape
    assert Din_w == Din and b.shape == (Dout,)
    assert gamma.shape == (Dout,) and beta.shape == (Dout,)

    itm_x = jnp.dtype(matmul_dtype).itemsize
    out_dtype = x.dtype
    itm_o = jnp.dtype(out_dtype).itemsize

    vmem_cap = _vmem_capacity_bytes()
    # Headroom for compiler-internal scratch / double-buffer overshoot
    # (matters most on v7x's 64 MiB VMEM).
    vmem_budget = max(16 * 1024 * 1024, vmem_cap - 12 * 1024 * 1024)
    big_chip = vmem_cap >= 96 * 1024 * 1024          # v5e / v6e: 128 MiB VMEM

    def footprint(tn, tk, k_steps):
        w_bufs = 1 if k_steps == 1 else 2            # resident W is single-buffered
        return (2 * tn * tk * itm_x                  # x tile, double-buffered
                + w_bufs * tk * Dout * itm_x         # weight slab / slice
                + 2 * tn * Dout * itm_o              # output tile, double-buffered
                + (0 if k_steps == 1 else tn * Dout * 4)   # f32 accumulator
                + 3 * 8 * Dout * 4)                  # bias/gamma/beta, sublane-padded

    # K tiling: keep the whole weight resident whenever it fits in ~half VMEM.
    w_bytes = Din * Dout * itm_x
    if w_bytes <= vmem_budget // 2:
        tile_k, k_steps = Din, 1
    else:
        tile_k = min(512, _round_up(Din, 128))
        k_steps = pl.cdiv(Din, tile_k)

    # Row tile: resident path is MXU-bound already; K-tiled path needs tall
    # tiles to amortize the weight re-stream on 128 MiB chips (v5e/v6e).
    n_pad8 = _round_up(N, 8)
    tn_target = 512 if k_steps == 1 else (1024 if big_chip else 512)
    tile_n = min(tn_target, n_pad8)
    # Keep >= 2 row tiles when possible so "parallel" can shard over v7x cores.
    if n_pad8 > 8 and pl.cdiv(n_pad8, tile_n) < 2:
        tile_n = _round_up(pl.cdiv(n_pad8, 2), 8)
    while tile_n > 8 and footprint(tile_n, tile_k, k_steps) > vmem_budget:
        tile_n = max(8, _round_up(tile_n // 2, 8))

    N_pad = _round_up(N, tile_n)
    Din_pad = tile_k * k_steps
    n_steps = N_pad // tile_n

    # bf16 operands for the MXU; W pre-transposed ONCE so the kernel matmul is
    # the canonical [M,K]x[K,N] form. f32 params for the epilogue.
    xm = x.astype(matmul_dtype)
    wm = w.T.astype(matmul_dtype)
    if N_pad != N:
        xm = jnp.pad(xm, ((0, N_pad - N), (0, 0)))
    if Din_pad != Din:
        xm = jnp.pad(xm, ((0, 0), (0, Din_pad - Din)))
        wm = jnp.pad(wm, ((0, Din_pad - Din), (0, 0)))
    b2 = b.reshape(1, Dout).astype(jnp.float32)
    g2 = gamma.reshape(1, Dout).astype(jnp.float32)
    bt2 = beta.reshape(1, Dout).astype(jnp.float32)

    vmem_limit = int(min(
        vmem_budget,
        max(32 * 1024 * 1024,
            footprint(tile_n, tile_k, k_steps) * 13 // 10 + (2 << 20))))

    w_stream = 1 if k_steps == 1 else n_steps        # real HBM traffic for W
    cost = pl.CostEstimate(
        flops=2 * N_pad * Din_pad * Dout + 8 * N_pad * Dout,
        transcendentals=N_pad,                       # one rsqrt per row
        bytes_accessed=(N_pad * Din_pad * itm_x
                        + w_stream * Din_pad * Dout * itm_x
                        + 3 * Dout * 4
                        + N_pad * Dout * itm_o),
    )

    if k_steps == 1:
        grid_spec = pltpu.PrefetchScalarGridSpec(
            num_scalar_prefetch=0,
            grid=(n_steps,),
            in_specs=[
                pl.BlockSpec((tile_n, Din_pad), lambda i: (i, 0)),   # x
                _const_spec((Din_pad, Dout), lambda i: (0, 0)),      # W (resident)
                _const_spec((1, Dout), lambda i: (0, 0)),            # bias
                _const_spec((1, Dout), lambda i: (0, 0)),            # gamma
                _const_spec((1, Dout), lambda i: (0, 0)),            # beta
            ],
            out_specs=pl.BlockSpec((tile_n, Dout), lambda i: (i, 0)),
        )
        kernel = functools.partial(mlp_block_kernel_resident, eps=eps)
        dim_sem = ("parallel",)
    else:
        grid_spec = pltpu.PrefetchScalarGridSpec(
            num_scalar_prefetch=0,
            grid=(n_steps, k_steps),
            in_specs=[
                pl.BlockSpec((tile_n, tile_k), lambda i, k: (i, k)),  # x
                pl.BlockSpec((tile_k, Dout), lambda i, k: (k, 0)),    # W slice
                _const_spec((1, Dout), lambda i, k: (0, 0)),          # bias
                _const_spec((1, Dout), lambda i, k: (0, 0)),          # gamma
                _const_spec((1, Dout), lambda i, k: (0, 0)),          # beta
            ],
            out_specs=pl.BlockSpec((tile_n, Dout), lambda i, k: (i, 0)),
            scratch_shapes=[pltpu.VMEM((tile_n, Dout), jnp.float32)],
        )
        kernel = functools.partial(mlp_block_kernel_ktiled, eps=eps)
        dim_sem = ("parallel", "arbitrary")

    out = pl.pallas_call(
        kernel,
        out_shape=jax.ShapeDtypeStruct((N_pad, Dout), out_dtype),
        grid_spec=grid_spec,
        compiler_params=pltpu.CompilerParams(
            dimension_semantics=dim_sem,
            vmem_limit_bytes=vmem_limit),
        cost_estimate=cost,
    )(xm, wm, b2, g2, bt2)

    return out[:N] if N_pad != N else out


if __name__ == "__main__":
    key = jax.random.PRNGKey(0)
    kx, kw, kb, kg, kbe = jax.random.split(key, 5)

    B, S, Din, Dout = 2, 8, 128, 256            # N = B*S = 16 token rows
    x = jax.random.normal(kx, (B, S, Din), dtype=jnp.float32)
    w = jax.random.normal(kw, (Dout, Din), dtype=jnp.float32) * 0.05
    b = jax.random.normal(kb, (Dout,), dtype=jnp.float32) * 0.01
    gamma = 1.0 + 0.1 * jax.random.normal(kg, (Dout,), dtype=jnp.float32)
    beta = 0.1 * jax.random.normal(kbe, (Dout,), dtype=jnp.float32)

    x2 = x.reshape(B * S, Din)
    out = mlp_block(x2, w, b, gamma, beta)
    out = jax.block_until_ready(out).reshape(B, S, Dout)

    # Reference (same bf16-matmul / f32-accumulate precision; two-pass LN).
    y = jnp.dot(x2.astype(jnp.bfloat16), w.astype(jnp.bfloat16).T,
                preferred_element_type=jnp.float32) + b
    y = jnp.maximum(y, 0.0)
    mean = y.mean(axis=-1, keepdims=True)
    var = jnp.mean((y - mean) ** 2, axis=-1, keepdims=True)
    ref = ((y - mean) * lax.rsqrt(var + 1e-5)) * gamma + beta
    ref = ref.reshape(B, S, Dout)

    assert out.shape == (B, S, Dout)
    assert jnp.allclose(out, ref, atol=1e-2, rtol=1e-2), "mismatch vs reference"

    print("KERNEL_OK")
</pallas_src>

<mosaic_0001>
module attributes {stable_mosaic.version = 11 : i64} {
  func.func @mlp_block_kernel_resident(%arg0: i32, %arg1: memref<8x128xbf16, #tpu.memory_space<vmem>>, %arg2: memref<128x256xbf16, #tpu.memory_space<vmem>>, %arg3: memref<1x256xf32, #tpu.memory_space<vmem>>, %arg4: memref<1x256xf32, #tpu.memory_space<vmem>>, %arg5: memref<1x256xf32, #tpu.memory_space<vmem>>, %arg6: memref<8x256xf32, #tpu.memory_space<vmem>>) attributes {dimension_semantics = [#tpu.dimension_semantics<parallel>], iteration_bounds = array<i64: 2>, scalar_prefetch = 0 : i64, scratch_operands = 0 : i64, tpu.core_type = #tpu.core_type<tc>, window_params = [{transform_indices = @transform_0, window_bounds = array<i64: 8, 128>}, {pipeline_mode = #tpu.pipeline_mode<synchronous>, transform_indices = @transform_1, window_bounds = array<i64: 128, 256>}, {pipeline_mode = #tpu.pipeline_mode<synchronous>, transform_indices = @transform_2, window_bounds = array<i64: 1, 256>}, {pipeline_mode = #tpu.pipeline_mode<synchronous>, transform_indices = @transform_3, window_bounds = array<i64: 1, 256>}, {pipeline_mode = #tpu.pipeline_mode<synchronous>, transform_indices = @transform_4, window_bounds = array<i64: 1, 256>}, {transform_indices = @transform_5, window_bounds = array<i64: 8, 256>}]} {
    %c0 = arith.constant 0 : index
    %c0_0 = arith.constant 0 : index
    %0 = vector.load %arg1[%c0, %c0_0] : memref<8x128xbf16, #tpu.memory_space<vmem>>, vector<8x128xbf16>
    %c0_1 = arith.constant 0 : index
    %c0_2 = arith.constant 0 : index
    %1 = vector.load %arg2[%c0_1, %c0_2] : memref<128x256xbf16, #tpu.memory_space<vmem>>, vector<128x256xbf16>
    %cst = arith.constant dense<0.000000e+00> : vector<8x256xf32>
    %2 = tpu.matmul %0, %1, %cst {dimension_numbers = #tpu.dot_dimension_numbers<[1], [0], [0], [1], [0, 0, 1, 1], [], []>} : vector<8x128xbf16>, vector<128x256xbf16>, vector<8x256xf32> -> vector<8x256xf32>
    %c0_3 = arith.constant 0 : index
    %c0_4 = arith.constant 0 : index
    %3 = vector.load %arg3[%c0_3, %c0_4] : memref<1x256xf32, #tpu.memory_space<vmem>>, vector<1x256xf32>
    %4 = vector.broadcast %3 : vector<1x256xf32> to vector<8x256xf32>
    %5 = arith.addf %2, %4 : vector<8x256xf32>
    %c0_5 = arith.constant 0 : index
    %c0_6 = arith.constant 0 : index
    %6 = vector.load %arg4[%c0_5, %c0_6] : memref<1x256xf32, #tpu.memory_space<vmem>>, vector<1x256xf32>
    %c0_7 = arith.constant 0 : index
    %c0_8 = arith.constant 0 : index
    %7 = vector.load %arg5[%c0_7, %c0_8] : memref<1x256xf32, #tpu.memory_space<vmem>>, vector<1x256xf32>
    %cst_9 = arith.constant 0.000000e+00 : f32
    %8 = vector.broadcast %cst_9 : f32 to vector<8x256xf32>
    %9 = arith.maximumf %5, %8 : vector<8x256xf32>
    %cst_10 = arith.constant dense<0.000000e+00> : vector<8xf32>
    %10 = vector.multi_reduction <add>, %9, %cst_10 [1] : vector<8x256xf32> to vector<8xf32>
    %11 = vector.shape_cast %10 : vector<8xf32> to vector<8x1xf32>
    %cst_11 = arith.constant 2.560000e+02 : f32
    %12 = vector.broadcast %cst_11 : f32 to vector<8x1xf32>
    %13 = arith.divf %11, %12 : vector<8x1xf32>
    %14 = arith.mulf %9, %9 : vector<8x256xf32>
    %cst_12 = arith.constant dense<0.000000e+00> : vector<8xf32>
    %15 = vector.multi_reduction <add>, %14, %cst_12 [1] : vector<8x256xf32> to vector<8xf32>
    %16 = vector.shape_cast %15 : vector<8xf32> to vector<8x1xf32>
    %cst_13 = arith.constant 2.560000e+02 : f32
    %17 = vector.broadcast %cst_13 : f32 to vector<8x1xf32>
    %18 = arith.divf %16, %17 : vector<8x1xf32>
    %19 = arith.mulf %13, %13 : vector<8x1xf32>
    %20 = arith.subf %18, %19 : vector<8x1xf32>
    %cst_14 = arith.constant 0.000000e+00 : f32
    %21 = vector.broadcast %cst_14 : f32 to vector<8x1xf32>
    %22 = arith.maximumf %20, %21 : vector<8x1xf32>
    %23 = vector.broadcast %13 : vector<8x1xf32> to vector<8x256xf32>
    %24 = arith.subf %9, %23 : vector<8x256xf32>
    %cst_15 = arith.constant 9.99999974E-6 : f32
    %25 = vector.broadcast %cst_15 : f32 to vector<8x1xf32>
    %26 = arith.addf %22, %25 : vector<8x1xf32>
    %27 = math.rsqrt %26 : vector<8x1xf32>
    %28 = vector.broadcast %27 : vector<8x1xf32> to vector<8x256xf32>
    %29 = arith.mulf %24, %28 : vector<8x256xf32>
    %30 = vector.broadcast %6 : vector<1x256xf32> to vector<8x256xf32>
    %31 = arith.mulf %29, %30 : vector<8x256xf32>
    %32 = vector.broadcast %7 : vector<1x256xf32> to vector<8x256xf32>
    %33 = arith.addf %31, %32 : vector<8x256xf32>
    %c0_16 = arith.constant 0 : index
    %c0_17 = arith.constant 0 : index
    %34 = vector.load %arg6[%c0_16, %c0_17] : memref<8x256xf32, #tpu.memory_space<vmem>>, vector<8x256xf32>
    tpu.vector_store %arg6[%c0_16, %c0_17], %33 {strides = array<i32>} : memref<8x256xf32, #tpu.memory_space<vmem>>, vector<8x256xf32>,
    return
  }
  func.func @transform_0(%arg0: i32) -> (i32, i32) {
    %c0_i32 = arith.constant 0 : i32
    %c0_i32_0 = arith.constant 0 : i32
    return %arg0, %c0_i32 : i32, i32
  }
  func.func @transform_1(%arg0: i32) -> (i32, i32) {
    %c0_i32 = arith.constant 0 : i32
    %c0_i32_0 = arith.constant 0 : i32
    %c0_i32_1 = arith.constant 0 : i32
    return %c0_i32, %c0_i32_0 : i32, i32
  }
  func.func @transform_2(%arg0: i32) -> (i32, i32) {
    %c0_i32 = arith.constant 0 : i32
    %c0_i32_0 = arith.constant 0 : i32
    %c0_i32_1 = arith.constant 0 : i32
    return %c0_i32, %c0_i32_0 : i32, i32
  }
  func.func @transform_3(%arg0: i32) -> (i32, i32) {
    %c0_i32 = arith.constant 0 : i32
    %c0_i32_0 = arith.constant 0 : i32
    %c0_i32_1 = arith.constant 0 : i32
    return %c0_i32, %c0_i32_0 : i32, i32
  }
  func.func @transform_4(%arg0: i32) -> (i32, i32) {
    %c0_i32 = arith.constant 0 : i32
    %c0_i32_0 = arith.constant 0 : i32
    %c0_i32_1 = arith.constant 0 : i32
    return %c0_i32, %c0_i32_0 : i32, i32
  }
  func.func @transform_5(%arg0: i32) -> (i32, i32) {
    %c0_i32 = arith.constant 0 : i32
    %c0_i32_0 = arith.constant 0 : i32
    return %arg0, %c0_i32 : i32, i32
  }
}

</mosaic_0001>

<bundles_post_ra>
// kernel: tpu_custom_call.1
= control target key start
LH: loop header
LB: loop body
LE: loop exit
PB: predicated region body
PF: predicated region fallthrough
CT: control target
= control target key end

     0   :  { %10 = vsyncpa [#allocation3], 0  ;;  %s1046_s0 = inlined_call_operand.hbm [shape: bf16[16,128], index: 0, kind: input, shape index: {}]   ;;  %s1047_s1 = inlined_call_operand.hbm [shape: bf16[128,256], index: 1, kind: input, shape index: {}]   ;;  %s1048_s2 = inlined_call_operand.vmem [shape: f32[1,256], index: 2, kind: input, shape index: {}]   ;;  %s1049_s3 = inlined_call_operand.vmem [shape: f32[1,256], index: 3, kind: input, shape index: {}]   ;;  %s1050_s4 = inlined_call_operand.vmem [shape: f32[1,256], index: 4, kind: input, shape index: {}]   ;;  %s1051_s5 = inlined_call_operand.hbm [shape: f32[16,256], index: 5, kind: output, shape index: {}]  }
   0x1   :  { %12 = vsyncpa [#allocation3 + $0x1], 0 }
   0x2   :  { %13 = vsyncpa [#allocation6], 0 }
   0x3   :  { %14 = vsyncpa [#allocation4], 0 }
   0x4   :  { %16 = vsyncpa [#allocation4 + $0x1], 0  ;;  %s837_s18 = smov 0   ;;  %s839_s19 = smov 0  }
   0x5   :  { %s841_s20 = smov 0   ;;  %s843_s21 = smov 0  }
   0x6 LB: > { %s858_s22 = sadd.s32 4294967295, %s799_s21   ;;  %s553_s23 = sadd.s32 4294967294, %s799_s21   ;;  %s799_s21 = sphi %s843_s21, %s1071_s21   ;;  %s795_s20 = sphi %s841_s20, %s1070_s20   ;;  %s791_s19 = sphi %s839_s19, %s1069_s19   ;;  %s787_s18 = sphi %s837_s18, %s1068_s18  }
   0x7   : > { %p42_p0 = scmp.ne.s32.totalorder %s791_s19, %s787_s18  ;;  %p1052_p1 = scmp.eq.s32.totalorder %s858_s22, 0 }
   0x8   : > { %p156_p3 = scmp.eq.s32.totalorder %s553_s23, 1  ;;  %p554_p5 = scmp.ge.s32.totalorder %s799_s21, 1 }
   0x9   : > { %p867_p4 = por %p1052_p1, %p42_p0  ;;  %p163_p7 = scmp.lt.s32.totalorder %s799_s21, 3 }
   0xa   : > { %p872_p6 = por %p156_p3, %p42_p0  ;;  %s801_s27 = smov [#allocation5]  }
   0xb   : > { %s1055_s24 = scalar_select %p867_p4, 1, 0 }
   0xc   : > { %s1056_s25 = scalar_select %p872_p6, 1, 0 }
   0xd   : > { %p877_p8 = pnand %p554_p5, %p163_p7  ;;  %s175_s28 = sshll.u32 %s801_s27, 4  ;;  %s881_s28 = int_to_ptr.vmem [resolvable:$true] %s175_s28 }
   0xe   : > { %s893_s30 = sadd.s32 1, %s799_s21   ;;  %s29_s6 = sadd.s32 1, %s795_s20 }
   0xf   : > { %s1057_s26 = scalar_select %p877_p8, 1, 0 }
  0x10   : > { %p593_p9 = pneg %p877_p8  ;;  %s26_s7 = ssub.s32 %s799_s21, %s893_s30 }
  0x11   : > { %s671_s10 = scalar_lea.hbm %s1047_s1, 2048 }
  0x12   : > { %p888_p11 = pnand %p593_p9, %p1052_p1  ;;  %p672_p12 = scmp.ne.s32.totalorder %s1047_s1, %s671_s10 }
  0x13   : > { %p678_p5 = scmp.lt.u32.totalorder %s671_s10, %s1047_s1 }
  0x14   : > { %p673_p13 = pneg %p888_p11 }
  0x16   : > { %p674_p0 = pnand %p673_p13, %p672_p12 }
  0x18   : > { %p675_p3 = pneg %p674_p0 }
  0x1a   : > { %p680_p7 = pnand %p678_p5, %p675_p3 }
  0x1c   : > { %683 = shalt.err (!%p680_p7)
}
  0x1d   : > { %s684_s15 = scalar_lea.vmem %s881_s28, 2048  ;;  %p692_p2 = scmp.lt.s32.totalorder %s881_s28, %s881_s28 }
  0x1e   : > { %p685_p9 = scmp.ne.s32.totalorder %s881_s28, %s684_s15  ;;  %p693_p6 = scmp.lt.s32.totalorder %s684_s15, %s684_s15 }
  0x20   : > { %p687_p10 = pnand %p685_p9, %p673_p13  ;;  %p694_p4 = por %p693_p6, %p692_p2 }
  0x22   : > { %p688_p1 = pneg %p687_p10 }
  0x24   : > { %p695_p8 = pnand %p694_p4, %p688_p1 }
  0x26   : > { %698 = shalt.err (!%p695_p8)
}
  0x27   : > { %s802_s16 = smov 128   ;;  %s803_s17 = smov 8  }
  0x28   : > { %596 = dma.hbm_to_vmem [thread:$0]  (!%p888_p11), %s1047_s1, 2048, %s881_s28, [#allocation6], %s802_s16, %s802_s16, %s803_s17  }
  0x29   : > { %p27_p2 = scmp.eq.s32.totalorder %s26_s7, 0  ;;  %p36_p1 = scmp.ne.s32.totalorder %s795_s20, %s791_s19 }
  0x2a   : > { %p37_p4 = scmp.eq.s32.totalorder %s799_s21, 0  ;;  %p606_p6 = scmp.lt.s32.totalorder %s799_s21, 2 }
  0x2b   : > { %s924_s8 = scalar_select %p27_p2, %s795_s20, %s29_s6  }
  0x2c   : > { %p38_p8 = por %p37_p4, %p36_p1  ;;  %p1059_p10 = scmp.eq.s32.totalorder %s858_s22, 1 }
  0x2d   : > { %s198_s10 = sand.u32 1, %s795_s20   ;;  %s558_s11 = sshll.u32 %s799_s21, 6 }
  0x2e   : > { %p928_p12 = por %p1059_p10, %p36_p1  ;;  %s557_s12 = sshll.u32 %s198_s10, 2 }
  0x2f   : > { %s937_s14 = scalar_lea.hbm %s1046_s0, %s558_s11  ;;  %s202_s28 = scalar_lea.vmem [#allocation2], %s557_s12 }
  0x30   : > { %s209_s6 = sshll.u32 %s202_s28, 4  ;;  %p939_p11 = pnand %p606_p6, %p38_p8  ;;  %s943_s6 = int_to_ptr.vmem [resolvable:$true] %s209_s6 }
  0x31   : > { %s199_s15 = scalar_lea.sflag [#allocation3], %s198_s10  ;;  %s699_s16 = scalar_lea.hbm %s937_s14, 64 }
  0x32   : > { %p700_p13 = scmp.ne.s32.totalorder %s937_s14, %s699_s16  ;;  %p701_p0 = pneg %p939_p11 }
  0x33   : > { %s704_s27 = scalar_lea.hbm %s1046_s0, 128  ;;  %p705_p7 = scmp.lt.u32.totalorder %s937_s14, %s1046_s0 }
  0x34   : > { %p702_p3 = pnand %p701_p0, %p700_p13  ;;  %p706_p9 = scmp.lt.u32.totalorder %s704_s27, %s699_s16 }
  0x35   : > { %p708_p1 = scmp.lt.u32.totalorder %s699_s16, %s937_s14 }
  0x36   : > { %p703_p5 = pneg %p702_p3  ;;  %p707_p2 = por %p706_p9, %p705_p7 }
  0x38   : > { %p709_p4 = por %p708_p1, %p707_p2 }
  0x3a   : > { %p710_p6 = pnand %p709_p4, %p703_p5 }
  0x3c   : > { %713 = shalt.err (!%p710_p6)
}
  0x3d   : > { %s714_s10 = scalar_lea.vmem %s943_s6, 64  ;;  %s804_s29 = smov [#allocation2]  }
  0x3e   : > { %p715_p8 = scmp.ne.s32.totalorder %s943_s6, %s714_s10  ;;  %s719_s13 = sshll.u32 %s804_s29, 4  ;;  %s720_s13 = int_to_ptr.vmem [resolvable:$false] %s719_s13 }
  0x3f   : > { %s721_s28 = scalar_lea.vmem %s720_s13, 128  ;;  %p722_p3 = scmp.lt.s32.totalorder %s943_s6, %s720_s13 }
  0x40   : > { %p717_p10 = pnand %p715_p8, %p701_p0  ;;  %p723_p7 = scmp.lt.s32.totalorder %s721_s28, %s714_s10 }
  0x42   : > { %p718_p13 = pneg %p717_p10  ;;  %p724_p9 = por %p723_p7, %p722_p3 }
  0x44   : > { %p725_p2 = pnand %p724_p9, %p718_p13 }
  0x46   : > { %728 = shalt.err (!%p725_p2)
}
  0x47   : > { %600 = dma.hbm_to_vmem [thread:$0]  (!%p939_p11), %s937_s14, 64, %s943_s6, %s199_s15  }
  0x48   : > { %p1062_p5 = scmp.ne.s32.totalorder %s1057_s26, 0 }
  0x49   : > { %s973_s16 = sand.u32 (!%p1062_p5), 1, %s791_s19   ;;  %p1063_p0 = scmp.ne.s32.totalorder (!%p1062_p5), %s1055_s24, 0 }
  0x4a   : > { %218 = sbr.rel (%p1062_p5) target bundleno = 522 (0x20a), region = 40  ;;  %s560_s17 = sshll.u32 (!%p1062_p5), %s973_s16, 2 }
  0x4b   : > { %s221_s23 = scalar_lea.sflag (!%p1062_p5), [#allocation3], %s973_s16  ;;  %s977_s27 = scalar_lea.vmem (!%p1062_p5), [#allocation2], %s560_s17 }
  0x51   : > { %774 = dma.done.wait (%p1063_p0), %s221_s23, 64  }
  0x52   : > { %776 = vsyncadd (%p1063_p0), %s221_s23, 4294967232  ;;  %p1064_p11 = scmp.eq.s32.totalorder %s858_s22, 0 }
  0x54   : > { %778 = dma.done.wait (%p1064_p11), [#allocation6], 2048   ;;  %p1065_p1 = pmov %p1064_p11 }
  0x55   : > { %v805_v0 = vmov 0   ;;  %v645_v1 = vld [vmem:[#allocation5 + $0x4] ss:$8 sps:$4 sm:$0xff]   ;;  %v647_v2 = vld [vmem:[#allocation5] ss:$8 sps:$4 sm:$0xff]   ;;  %v275_v18 = vlaneseq  ;;  %s562_s7 = sshll.u32 %s973_s16, 4 }
  0x56   : > { %780 = vsyncadd (%p1065_p1), [#allocation6], 4294965248  ;;  %397 = vmatprep.mubr.bf16.mxu0 %v805_v0  ;;  %365 = vmatprep.subr.bf16.mxu0 %v645_v1  ;;  %v648_v3 = vld [vmem:[#allocation5 + $0x14] ss:$8 sps:$4 sm:$0xff]   ;;  %v650_v4 = vld [vmem:[#allocation5 + $0x10] ss:$8 sps:$4 sm:$0xff]  }
  0x57   : > { %366 = vmatpush1.bf16.msra.mxu0 %v647_v2  ;;  %v651_v5 = vld [vmem:[#allocation5 + $0x24] ss:$8 sps:$4 sm:$0xff]   ;;  %v653_v6 = vld [vmem:[#allocation5 + $0x20] ss:$8 sps:$4 sm:$0xff]   ;;  %v654_v7 = vld [vmem:[#allocation5 + $0x34] ss:$8 sps:$4 sm:$0xff]  }
  0x58   : > { %367 = vmatprep.subr.bf16.mxu0 %v648_v3  ;;  %v656_v8 = vld [vmem:[#allocation5 + $0x30] ss:$8 sps:$4 sm:$0xff]   ;;  %v657_v9 = vld [vmem:[#allocation5 + $0x44] ss:$8 sps:$4 sm:$0xff]   ;;  %v659_v10 = vld [vmem:[#allocation5 + $0x40] ss:$8 sps:$4 sm:$0xff]  }
  0x59   : > { %v660_v11 = vld [vmem:[#allocation5 + $0x54] ss:$8 sps:$4 sm:$0xff]   ;;  %v662_v12 = vld [vmem:[#allocation5 + $0x50] ss:$8 sps:$4 sm:$0xff]   ;;  %v663_v13 = vld [vmem:[#allocation5 + $0x64] ss:$8 sps:$4 sm:$0xff]  }
  0x5a   : > { %v665_v14 = vld [vmem:[#allocation5 + $0x60] ss:$8 sps:$4 sm:$0xff]   ;;  %v666_v15 = vld [vmem:[#allocation5 + $0x74] ss:$8 sps:$4 sm:$0xff]   ;;  %v668_v16 = vld [vmem:[#allocation5 + $0x70] ss:$8 sps:$4 sm:$0xff]  }
  0x5b   : > { %368 = vmatpush1.bf16.msra.mxu0 %v650_v4  ;;  %v256_v17 = vld [vmem:[%s977_s27] sm:$0xf]  ;;  %v276_v19 = vshrl.u32 %v275_v18, 7  ;;  %s584_s12 = sshll.u32 %s858_s22, 8  ;;  %s254_s10 = scalar_lea.vmem [#allocation7], %s562_s7 }
  0x5c   : > { %369 = vmatprep.subr.bf16.mxu0 %v651_v5  ;;  %v273_v21 = vld [vmem:[%s1048_s2] sm:$0x3]  ;;  %s473_s29 = sshll.u32 %s254_s10, 4  ;;  %s1002_s17 = scalar_lea.hbm %s1051_s5, %s584_s12  ;;  %s1004_s29 = int_to_ptr.vmem [resolvable:$true] %s473_s29 }
  0x5d   : > { %v277_v20 = vsub.s32 0, %v276_v19  ;;  %v281_v22 = vsub.s32 1, %v276_v19  ;;  %v406_v45 = vld [vmem:[%s1049_s3] sm:$0x3]  ;;  %s459_s23 = scalar_lea.sflag [#allocation4], %s973_s16  ;;  %s729_s22 = scalar_lea.vmem %s1004_s29, 256 }
  0x5e   : > { %v407_v46 = vld [vmem:[%s1050_s4] sm:$0x3]  ;;  %p730_p4 = scmp.ne.s32.totalorder %s1004_s29, %s729_s22  ;;  %s806_s27 = smov [#allocation7]  }
  0x5f   : > { %370 = vmatpush1.bf16.msra.mxu0 %v653_v6  ;;  %v278_v23 = vrot.slane %v273_v21, %v277_v20  ;;  %v282_v24 = vrot.slane %v273_v21, %v281_v22  ;;  %v434_v47 = vrot.slane %v406_v45, %v277_v20  ;;  %v438_v48 = vrot.slane %v406_v45, %v281_v22  ;;  %s733_s24 = sshll.u32 %s806_s27, 4  ;;  %s734_s24 = int_to_ptr.vmem [resolvable:$false] %s733_s24 }
  0x60   : > { %371 = vmatprep.subr.bf16.mxu0 %v654_v7  ;;  %v447_v52 = vrot.slane %v407_v46, %v277_v20  ;;  %v451_v53 = vrot.slane %v407_v46, %v281_v22  ;;  %p731_p6 = pnand %p730_p4, %p928_p12  ;;  %s735_s26 = scalar_lea.vmem %s734_s24, 512 }
  0x61   : > { %p736_p10 = scmp.lt.s32.totalorder %s1004_s29, %s734_s24  ;;  %p737_p13 = scmp.lt.s32.totalorder %s735_s26, %s729_s22 }
  0x62   : > { %p732_p8 = pneg %p731_p6 }
  0x63   : > { %372 = vmatpush1.bf16.msra.mxu0 %v656_v8  ;;  %p738_p3 = por %p737_p13, %p736_p10 }
  0x64   : > { %373 = vmatprep.subr.bf16.mxu0 %v657_v9 }
  0x65   : > { %p739_p7 = pnand %p738_p3, %p732_p8 }
  0x67   : > { %374 = vmatpush1.bf16.msra.mxu0 %v659_v10 }
  0x68   : > { %375 = vmatprep.subr.bf16.mxu0 %v660_v11 }
  0x6b   : > { %376 = vmatpush1.bf16.msra.mxu0 %v662_v12 }
  0x6c   : > { %377 = vmatprep.subr.bf16.mxu0 %v663_v13 }
  0x6f   : > { %378 = vmatpush1.bf16.msra.mxu0 %v665_v14 }
  0x70   : > { %379 = vmatprep.subr.bf16.mxu0 %v666_v15 }
  0x73   : > { %380 = vmatpush1.bf16.msra.mxu0 %v668_v16 }
  0x76   : > { %398 = vmatmul.mubr.bf16.vlgmr.msra.gmra.mrb[0].mxu0 %v256_v17 }
 0x149   : > { %v399_v25 = vpop.f32.mrb[0].mxu0 }
 0x14a   : > { %v400_v26 = vadd.f32 %v399_v25, %v278_v23  ;;  %v401_v27 = vpop.f32.mrb[1].mxu0 }
 0x14b   : > { %v402_v28 = vadd.f32 %v401_v27, %v282_v24  ;;  %v403_v29 = vpop.f32.mrb[2].mxu0 }
 0x14c   : > { %v408_v30 = vmax.f32 %v400_v26, 0.0  ;;  %v404_v31 = vpop.f32.mrb[3].mxu0 }
 0x14d   : > { %v409_v32 = vmax.f32 %v402_v28, 0.0 }
 0x14e   : > { %v415_v34 = vmul.f32 %v408_v30, %v408_v30 }
 0x14f   : > { %v410_v33 = vadd.f32 %v409_v32, %v408_v30  ;;  %v416_v35 = vmul.f32 %v409_v32, %v409_v32 }
 0x151   : > { %411 = vadd.xlane.f32.xlu0 %v410_v33  ;;  %v417_v36 = vadd.f32 %v416_v35, %v415_v34 }
 0x155   : > { %418 = vadd.xlane.f32.xlu0 %v417_v36 }
 0x1de   : > { %v412_v37 = vpop.xlane.xlu0 %411 }
 0x1df   : > { %v414_v38 = vmul.f32 0.00390625, %v412_v37 }
 0x1e1   : > { %v421_v40 = vmul.f32 %v414_v38, %v414_v38  ;;  %v424_v49 = vsub.f32 %v408_v30, %v414_v38  ;;  %v425_v50 = vsub.f32 %v409_v32, %v414_v38 }
 0x1e2   : > { %v419_v39 = vpop.xlane.xlu0 %418 }
 0x1e3   : > { %v420_v41 = vmul.f32 0.00390625, %v419_v39 }
 0x1e5   : > { %v422_v42 = vsub.f32 %v420_v41, %v421_v40 }
 0x1e7   : > { %v423_v43 = vmax.f32 %v422_v42, 0.0 }
 0x1e9   : > { %v426_v44 = vadd.f32 1e-05, %v423_v43 }
 0x1eb   : > { %669 = vrsqrt.f32 %v426_v44 }
 0x1f5   : > { %v670_v51 = vpop.eup %669 }
 0x1f6   : > { %v428_v54 = vmul.f32 %v670_v51, %v424_v49  ;;  %v429_v55 = vmul.f32 %v670_v51, %v425_v50 }
 0x1f8   : > { %v441_v56 = vmul.f32 %v434_v47, %v428_v54  ;;  %v442_v57 = vmul.f32 %v438_v48, %v429_v55 }
 0x1fa   : > { %v454_v58 = vadd.f32 %v447_v52, %v441_v56  ;;  %v455_v59 = vadd.f32 %v451_v53, %v442_v57 }
 0x1fc   : > { %456 = vst [vmem:[%s254_s10] sm:$0xff] %v454_v58  ;;  %457 = vst [vmem:[%s254_s10 + $0x8] sm:$0xff] %v455_v59 }
 0x1fd   : > { %742 = shalt.err (!%p739_p7)
}
 0x1fe   : > { %s743_s16 = scalar_lea.hbm %s1002_s17, 256  ;;  %s747_s7 = scalar_lea.hbm %s1051_s5, 512 }
 0x1ff   : > { %p744_p9 = scmp.ne.s32.totalorder %s1002_s17, %s743_s16  ;;  %p748_p0 = scmp.lt.u32.totalorder %s1002_s17, %s1051_s5 }
 0x200   : > { %p749_p11 = scmp.lt.u32.totalorder %s747_s7, %s743_s16  ;;  %p751_p4 = scmp.lt.u32.totalorder %s743_s16, %s1002_s17 }
 0x201   : > { %p745_p2 = pnand %p744_p9, %p928_p12 }
 0x202   : > { %p750_p1 = por %p749_p11, %p748_p0 }
 0x203   : > { %p746_p5 = pneg %p745_p2 }
 0x204   : > { %p752_p6 = por %p751_p4, %p750_p1 }
 0x206   : > { %p753_p8 = pnand %p752_p6, %p746_p5 }
 0x208   : > { %756 = shalt.err (!%p753_p8)
}
 0x209   : > { %591 = dma.vmem_to_hbm [thread:$0]  (%p928_p12), %s1004_s29, 256, %s1002_s17, %s459_s23  }
 0x20a PF: > { %s485_s12 = sand.u32 1, %s787_s18   ;;  %p1066_p10 = scmp.ne.s32.totalorder %s1056_s25, 0 }
 0x20b   : > { %p1067_p13 = scmp.ge.s32.totalorder %s799_s21, 2  ;;  %s486_s10 = scalar_lea.sflag [#allocation4], %s485_s12 }
 0x20d   : > { %p602_p3 = pnand %p1067_p13, %p1066_p10 }
 0x20f   : > { %782 = dma.done.wait (!%p602_p3), %s486_s10, 256  }
 0x210   : > { %784 = vsyncadd (!%p602_p3), %s486_s10, 4294967040  ;;  %p19_p7 = scmp.ge.s32.totalorder %s893_s30, 4   ;;  %s1068_s18 = smov %s791_s19 }
 0x211   : > { %s1069_s19 = smov %s795_s20  ;;  %s1070_s20 = smov %s924_s8 }
 0x212   : > { %s1071_s21 = smov %s893_s30  ;;  %21 = sbr.rel (!%p19_p7) target bundleno = 6 (0x6), region = 89 }
 0x219   :  { %491 = vsyncpa [#allocation3], 1 }
 0x21a   :  { %493 = vsyncpa [#allocation3 + $0x1], 1 }
 0x21b   :  { %494 = vsyncpa [#allocation6], 1 }
 0x21c   :  { %495 = vsyncpa [#allocation4], 1 }
 0x21d   :  { %497 = vsyncpa [#allocation4 + $0x1], 1 }

</bundles_post_ra>
